<compile_context>
chip_gen: v7x
topology: tpu7x:2x2x1
jax: 0.10.0
libtpu: 0.0.40
codegen_flags: <defaults>
</compile_context>

<pallas_src>
import functools

import jax
import jax.numpy as jnp
from jax import lax
from jax.experimental import pallas as pl
from jax.experimental.pallas import tpu as pltpu


def _pick_tile(dim, prefs):
    """Largest preferred tile that evenly divides `dim`; else full extent."""
    for p in prefs:
        if p <= dim and dim % p == 0:
            return p
    return dim  # full-extent block is always a legal block shape


def _gram_kernel(a_ref, b_ref, o_ref, acc_ref, *, inv_divisor):
    # grid = (row tiles i, col tiles j, contraction tiles k over H*W)
    @pl.when(pl.program_id(2) == 0)
    def _init():
        acc_ref[...] = jnp.zeros_like(acc_ref)

    # features @ features.T : contract the last (lane) dim of both operands,
    # accumulate in f32 on the MXU.
    acc_ref[...] += lax.dot_general(
        a_ref[...],
        b_ref[...],
        dimension_numbers=(((1,), (1,)), ((), ())),
        preferred_element_type=jnp.float32,
    )

    @pl.when(pl.program_id(2) == pl.num_programs(2) - 1)
    def _finalize():
        # Fused normalization: multiply by precomputed 1/(N*C*H*W).
        o_ref[...] = (acc_ref[...] * inv_divisor).astype(o_ref.dtype)


@jax.jit
def gram_matrix(x):
    """Gram matrix of NCHW features: (V @ V.T) / (N*C*H*W), V = x.view(N*C, H*W)."""
    N, C, H, W = x.shape
    M, K = N * C, H * W
    feats = x.reshape(M, K)

    tm = _pick_tile(M, (256, 128, 64, 32, 16, 8))
    tn = tm
    # Large, lane-dense contraction tiles; worst case (256, 2048) keeps
    # 2 inputs x 2 buffers x (tile bytes) ~ 8 MiB << 16 MiB v5e scoped VMEM.
    tk = _pick_tile(K, (2048, 1024, 512, 256, 128))

    grid = (M // tm, M // tn, K // tk)
    kernel = functools.partial(_gram_kernel, inv_divisor=1.0 / float(M * K))

    return pl.pallas_call(
        kernel,
        out_shape=jax.ShapeDtypeStruct((M, M), jnp.float32),
        grid_spec=pltpu.PrefetchScalarGridSpec(
            num_scalar_prefetch=0,
            grid=grid,
            in_specs=[
                pl.BlockSpec((tm, tk), lambda i, j, k: (i, k)),
                pl.BlockSpec((tn, tk), lambda i, j, k: (j, k)),
            ],
            out_specs=pl.BlockSpec((tm, tn), lambda i, j, k: (i, j)),
            scratch_shapes=[pltpu.VMEM((tm, tn), jnp.float32)],
        ),
        compiler_params=pltpu.CompilerParams(
            dimension_semantics=("parallel", "parallel", "arbitrary")
        ),
    )(feats, feats)


def _mse_kernel(x_ref, y_ref, o_ref, *, inv_count):
    d = x_ref[...].astype(jnp.float32) - y_ref[...].astype(jnp.float32)
    o_ref[0, 0] = jnp.sum(d * d) * inv_count


def _mse(a, b):
    """MSE between two (M, M) Gram matrices -> f32 scalar (single-block reduction)."""
    M, Mn = a.shape
    kernel = functools.partial(_mse_kernel, inv_count=1.0 / float(M * Mn))
    out = pl.pallas_call(
        kernel,
        out_shape=jax.ShapeDtypeStruct((1, 1), jnp.float32),
        in_specs=[
            pl.BlockSpec((M, Mn), lambda: (0, 0)),
            pl.BlockSpec((M, Mn), lambda: (0, 0)),
        ],
        out_specs=pl.BlockSpec(memory_space=pltpu.MemorySpace.SMEM),
    )(a, b)
    return out[0, 0]


def style_loss_init(target_features):
    """StyleLoss.__init__: precompute the detached target Gram matrix."""
    return gram_matrix(target_features)


@jax.jit
def style_loss_forward(x, target_gram):
    """StyleLoss.forward: returns (input, loss) — loss = MSE(gram(x), target)."""
    g = gram_matrix(x)
    loss = _mse(g, target_gram)
    # The module returns its input unchanged; the loss is the side output
    # (returned explicitly instead of mutating module state).
    return x, loss


if __name__ == "__main__":
    key = jax.random.PRNGKey(0)
    k_tgt, k_in = jax.random.split(key)

    N, C, H, W = 2, 4, 16, 16
    target_features = jax.random.uniform(k_tgt, (N, C, H, W), dtype=jnp.float32)
    x = jax.random.uniform(k_in, (N, C, H, W), dtype=jnp.float32)

    target_gram = jax.block_until_ready(style_loss_init(target_features))
    out, loss = style_loss_forward(x, target_gram)
    out = jax.block_until_ready(out)
    loss = jax.block_until_ready(loss)

    # Reference in plain JAX (same semantics as the PyTorch module), high precision.
    hp = jax.lax.Precision.HIGHEST
    feats = x.reshape(N * C, H * W)
    tfeats = target_features.reshape(N * C, H * W)
    ref_gram = jnp.dot(feats, feats.T, precision=hp) / (N * C * H * W)
    ref_tgram = jnp.dot(tfeats, tfeats.T, precision=hp) / (N * C * H * W)
    ref_loss = jnp.mean((ref_gram - ref_tgram) ** 2)

    g = jax.block_until_ready(gram_matrix(x))

    assert out.shape == x.shape and out.dtype == x.dtype
    assert bool(jnp.all(out == x)), "forward must return input unchanged"
    assert jnp.allclose(g, ref_gram, atol=1e-3, rtol=1e-2), "gram mismatch"
    assert jnp.allclose(loss, ref_loss, atol=1e-6, rtol=2.5e-1), (
        float(loss),
        float(ref_loss),
    )

    print("KERNEL_OK")
</pallas_src>

<mosaic_0001>
module attributes {stable_mosaic.version = 11 : i64} {
  func.func @_gram_kernel(%arg0: i32, %arg1: i32, %arg2: i32, %arg3: memref<8x256xf32, #tpu.memory_space<vmem>>, %arg4: memref<8x256xf32, #tpu.memory_space<vmem>>, %arg5: memref<8x8xf32, #tpu.memory_space<vmem>>, %arg6: memref<8x8xf32, #tpu.memory_space<vmem>>) attributes {dimension_semantics = [#tpu.dimension_semantics<parallel>, #tpu.dimension_semantics<parallel>, #tpu.dimension_semantics<arbitrary>], iteration_bounds = array<i64: 1, 1, 1>, scalar_prefetch = 0 : i64, scratch_operands = 1 : i64, tpu.core_type = #tpu.core_type<tc>, window_params = [{transform_indices = @transform_0, window_bounds = array<i64: 8, 256>}, {transform_indices = @transform_1, window_bounds = array<i64: 8, 256>}, {transform_indices = @transform_2, window_bounds = array<i64: 8, 8>}]} {
    %c0_i32 = arith.constant 0 : i32
    %0 = arith.cmpi eq, %arg2, %c0_i32 : i32
    %1 = arith.extui %0 : i1 to i32
    %c0_i32_0 = arith.constant 0 : i32
    %2 = arith.cmpi ne, %1, %c0_i32_0 : i32
    scf.if %2 {
      %cst_10 = arith.constant 0.000000e+00 : f32
      %12 = vector.broadcast %cst_10 : f32 to vector<8x8xf32>
      %c0_11 = arith.constant 0 : index
      %c0_12 = arith.constant 0 : index
      %13 = vector.load %arg6[%c0_11, %c0_12] : memref<8x8xf32, #tpu.memory_space<vmem>>, vector<8x8xf32>
      tpu.vector_store %arg6[%c0_11, %c0_12], %12 {strides = array<i32>} : memref<8x8xf32, #tpu.memory_space<vmem>>, vector<8x8xf32>,
    } else {
    }
    %c0 = arith.constant 0 : index
    %c0_1 = arith.constant 0 : index
    %3 = vector.load %arg6[%c0, %c0_1] : memref<8x8xf32, #tpu.memory_space<vmem>>, vector<8x8xf32>
    %c0_2 = arith.constant 0 : index
    %c0_3 = arith.constant 0 : index
    %4 = vector.load %arg3[%c0_2, %c0_3] : memref<8x256xf32, #tpu.memory_space<vmem>>, vector<8x256xf32>
    %c0_4 = arith.constant 0 : index
    %c0_5 = arith.constant 0 : index
    %5 = vector.load %arg4[%c0_4, %c0_5] : memref<8x256xf32, #tpu.memory_space<vmem>>, vector<8x256xf32>
    %cst = arith.constant dense<0.000000e+00> : vector<8x8xf32>
    %6 = tpu.matmul %4, %5, %cst {dimension_numbers = #tpu.dot_dimension_numbers<[1], [1], [0], [0], [0, 0, 1, 0], [], []>} : vector<8x256xf32>, vector<8x256xf32>, vector<8x8xf32> -> vector<8x8xf32>
    %7 = arith.addf %3, %6 : vector<8x8xf32>
    %c0_6 = arith.constant 0 : index
    %c0_7 = arith.constant 0 : index
    %8 = vector.load %arg6[%c0_6, %c0_7] : memref<8x8xf32, #tpu.memory_space<vmem>>, vector<8x8xf32>
    tpu.vector_store %arg6[%c0_6, %c0_7], %7 {strides = array<i32>} : memref<8x8xf32, #tpu.memory_space<vmem>>, vector<8x8xf32>,
    %c0_i32_8 = arith.constant 0 : i32
    %9 = arith.cmpi eq, %arg2, %c0_i32_8 : i32
    %10 = arith.extui %9 : i1 to i32
    %c0_i32_9 = arith.constant 0 : i32
    %11 = arith.cmpi ne, %10, %c0_i32_9 : i32
    scf.if %11 {
      %c0_10 = arith.constant 0 : index
      %c0_11 = arith.constant 0 : index
      %12 = vector.load %arg6[%c0_10, %c0_11] : memref<8x8xf32, #tpu.memory_space<vmem>>, vector<8x8xf32>
      %cst_12 = arith.constant 4.8828125E-4 : f32
      %13 = vector.broadcast %cst_12 : f32 to vector<8x8xf32>
      %14 = arith.mulf %12, %13 : vector<8x8xf32>
      %c0_13 = arith.constant 0 : index
      %c0_14 = arith.constant 0 : index
      %15 = vector.load %arg5[%c0_13, %c0_14] : memref<8x8xf32, #tpu.memory_space<vmem>>, vector<8x8xf32>
      tpu.vector_store %arg5[%c0_13, %c0_14], %14 {strides = array<i32>} : memref<8x8xf32, #tpu.memory_space<vmem>>, vector<8x8xf32>,
    } else {
    }
    return
  }
  func.func @transform_0(%arg0: i32, %arg1: i32, %arg2: i32) -> (i32, i32) {
    %c0_i32 = arith.constant 0 : i32
    return %arg0, %arg2 : i32, i32
  }
  func.func @transform_1(%arg0: i32, %arg1: i32, %arg2: i32) -> (i32, i32) {
    %c0_i32 = arith.constant 0 : i32
    return %arg1, %arg2 : i32, i32
  }
  func.func @transform_2(%arg0: i32, %arg1: i32, %arg2: i32) -> (i32, i32) {
    %c0_i32 = arith.constant 0 : i32
    return %arg0, %arg1 : i32, i32
  }
}

</mosaic_0001>

<bundles_post_ra>
// kernel: gram_matrix.1
= control target key start
LH: loop header
LB: loop body
LE: loop exit
PB: predicated region body
PF: predicated region fallthrough
CT: control target
= control target key end

     0   :  { %vm16_vm0 = vcmask 64512   ;;  %v142_v3 = vmov 0.0   ;;  %s186_s0 = inlined_call_operand.vmem [shape: f32[8,256], index: 0, kind: input, shape index: {}, may-alias: {0,1}]   ;;  %s187_s1 = inlined_call_operand.vmem [shape: f32[8,256], index: 1, kind: input, shape index: {}, may-alias: {0,1}]   ;;  %s188_s2 = inlined_call_operand.hbm [shape: f32[8,8], index: 2, kind: output, shape index: {}]  }
   0x1   :  { %v22_v0 = vld [vmem:[%s187_s1 + $0x8] sm:$0xff]  ;;  %v21_v1 = vld [vmem:[%s187_s1] sm:$0xff]  ;;  %17 = vst.msk [vmem:[#allocation2] sm:$0xff] %vm16_vm0, %v142_v3 }
   0x2   :  { %v20_v2 = vld [vmem:[%s186_s0 + $0x8] sm:$0xff]  ;;  %23 = vmatprep.subr.mxu0 %v22_v0 }
   0x3   :  { %87 = vmatprep.mubr.f32.mxu0 %v20_v2 }
   0x4   :  { %7 = vsyncpa [#allocation4], 0  ;;  %24 = vmatpush1.xpose.msra.mxu0 %v21_v1  ;;  %v19_v4 = vld [vmem:[%s186_s0] sm:$0xff]  ;;  %s143_s1 = smov [#allocation3]  }
   0x5   :  { %s108_s17 = sshll.u32 %s143_s1, 4  ;;  %s109_s17 = int_to_ptr.vmem [resolvable:$true] %s108_s17 }
   0x6   :  { %s118_s18 = scalar_lea.vmem %s109_s17, 128  ;;  %p123_p1 = scmp.lt.s32.totalorder %s109_s17, %s109_s17 }
   0x7   :  { %88 = vmatmul.mubr.f32.vlgmr.msra.gmra.mrb[0].mxu0 %v19_v4  ;;  %p119_p0 = scmp.ne.s32.totalorder %s109_s17, %s118_s18  ;;  %p124_p2 = scmp.lt.s32.totalorder %s118_s18, %s118_s18 }
   0x8   :  { %v18_v5 = vld [vmem:[#allocation2] sm:$0xff] }
   0x9   :  { %p125_p3 = por %p124_p2, %p123_p1 }
   0xb   :  { %p126_p4 = pnand %p125_p3, %p119_p0 }
  0xda   :  { %v89_v6 = vpop.f32.mrb[0].mxu0 }
  0xdb   :  { %v93_v7 = vadd.f32 %v89_v6, %v18_v5  ;;  %v91_v8 = vpop.f32.mrb[1].mxu0 }
  0xdd   :  { %95 = vst.msk [vmem:[#allocation2] sm:$0xff] %vm16_vm0, %v93_v7 }
  0xe4   :  { %v99_v9 = vld [vmem:[#allocation2] sm:$0xff] }
  0xe5   :  { %v100_v10 = vmul.f32 0.00048828125, %v99_v9 }
  0xe7   :  { %101 = vst.msk [vmem:[#allocation3] sm:$0xff] %vm16_vm0, %v100_v10 }
  0xe8   :  { %129 = shalt.err (!%p126_p4)
}
  0xe9   :  { %s130_s20 = scalar_lea.hbm %s188_s2, 128 }
  0xea   :  { %p131_p5 = scmp.ne.s32.totalorder %s188_s2, %s130_s20  ;;  %p134_p6 = scmp.lt.u32.totalorder %s130_s20, %s188_s2 }
  0xec   :  { %p136_p7 = pnand %p134_p6, %p131_p5 }
  0xee   :  { %139 = shalt.err (!%p136_p7)
}
  0xef   :  { %111 = dma.vmem_to_hbm [thread:$0]  %s109_s17, 128, %s188_s2, [#allocation4]  }
  0xf0   :  { %140 = dma.done.wait [#allocation4], 128  }
  0xf1   :  { %141 = vsyncadd [#allocation4], 4294967168 }
  0xf2   :  { %115 = vsyncpa [#allocation4], 1 }

</bundles_post_ra>
